<compile_context>
chip_gen: v7x
topology: tpu7x:2x2x1
jax: 0.10.0
libtpu: 0.0.40
codegen_flags: <defaults>
</compile_context>

<pallas_src>
import math
import jax
import jax.numpy as jnp
from jax.experimental import pallas as pl
from jax.experimental.pallas import tpu as pltpu


def attn_kernel(enc_ref, hid_ref, w_enc_ref, w_hid_ref, bias_ref, v_ref, out_ref):
    TB, S, H = enc_ref.shape
    cdt = enc_ref.dtype  # compute dtype for MXU operands / tanh (f32 default, bf16 opt.)

    # Hidden projection with the bias folded in: computed once per batch tile. (TB, H) f32
    hid_proj = (
        jnp.dot(hid_ref[...], w_hid_ref[...], preferred_element_type=jnp.float32)
        + bias_ref[...]
    )

    # Encoder projection on the MXU: (TB*S, H) @ (H, H) with f32 accumulation.
    enc = enc_ref[...].reshape(TB * S, H)
    enc_proj = jnp.dot(enc, w_enc_ref[...], preferred_element_type=jnp.float32)

    # energy = tanh(enc_proj + (hid_proj + b)); tanh runs on the EUP (bf16 EUP on v6e/v7x).
    pre = enc_proj.reshape(TB, S, H) + hid_proj[:, None, :]
    energy = jnp.tanh(pre.astype(cdt)).astype(jnp.float32)

    # score[b,s] = energy[b,s,:] . v  -- VPU multiply + XLU lane reduce (no N=1 matmul).
    scores = jnp.sum(energy * v_ref[...].reshape(1, 1, H), axis=-1)  # (TB, S) f32

    # Numerically-stable softmax over the sequence axis.
    m = jnp.max(scores, axis=-1, keepdims=True)
    e = jnp.exp(scores - m)
    denom = jnp.sum(e, axis=-1, keepdims=True)
    out_ref[...] = e * pl.reciprocal(denom, approx=True)


def _pick_batch_tile(B, S, H, itemsize, vmem_budget_bytes=8 << 20):
    """Pick a batch tile: the whole batch if tiny, else a multiple of 8 dividing B
    whose per-step footprint stays well under the scoped-VMEM default (v7x: 32 MiB
    scoped / 64 MiB physical; the 8 MiB budget leaves ample double-buffer headroom)."""
    if B <= 8:
        return B
    per_row = 2 * S * H * itemsize + 3 * S * H * 4  # dbl-buffered enc tile + f32 intermediates
    fixed = 2 * H * H * itemsize + 4 * H * 4        # weights + bias + v (replicated)
    tb = max(8, min(B, (vmem_budget_bytes - fixed) // max(per_row, 1)))
    tb = (tb // 8) * 8
    tb = min(tb, B)
    while tb > 0 and B % tb:
        tb -= 8
    if tb <= 0:
        tb = B  # fallback: B not 8-divisible -> single step (fine for small B)
    return int(tb)


def attn_forward(encoder_outputs, hidden, weight, bias, v,
                 *, compute_dtype=jnp.float32, batch_tile=None):
    """encoder_outputs: (B,S,H) f32, hidden: (B,H) f32, weight: (H,2H), bias: (H,), v: (H,).
    Returns (B, 1, S) f32 attention weights (softmax over S), matching the PyTorch module."""
    B, S, H = encoder_outputs.shape

    # Split & transpose the Linear weight so the kernel does plain matmuls:
    #   y = hidden @ Wh^T + enc @ We^T + b  with  W = [Wh | We]  (cat([hidden, enc]) order)
    w_hid_t = weight[:, :H].T.astype(compute_dtype)   # (H, H)
    w_enc_t = weight[:, H:].T.astype(compute_dtype)   # (H, H)
    bias2d = bias.reshape(1, H).astype(jnp.float32)
    v2d = v.reshape(1, H).astype(jnp.float32)

    enc = encoder_outputs.astype(compute_dtype)
    hid = hidden.astype(compute_dtype)

    tb = int(batch_tile) if batch_tile is not None else _pick_batch_tile(
        B, S, H, jnp.dtype(compute_dtype).itemsize)
    # Keep the (8,128)-tiling rule on the 2-D hidden/output blocks.
    if tb != B:
        assert tb % 8 == 0 and B % tb == 0, (B, tb)
    grid = (pl.cdiv(B, tb),)

    rep2 = lambda shape: pl.BlockSpec(shape, lambda b: (0, 0))  # replicated params

    out2d = pl.pallas_call(
        attn_kernel,
        out_shape=jax.ShapeDtypeStruct((B, S), jnp.float32),
        grid=grid,
        in_specs=[
            pl.BlockSpec((tb, S, H), lambda b: (b, 0, 0)),   # encoder_outputs tile
            pl.BlockSpec((tb, H), lambda b: (b, 0)),         # hidden tile
            rep2((H, H)),                                    # We^T
            rep2((H, H)),                                    # Wh^T
            rep2((1, H)),                                    # bias
            rep2((1, H)),                                    # v
        ],
        out_specs=pl.BlockSpec((tb, S), lambda b: (b, 0)),   # lane dim = S, 2-D output
        compiler_params=pltpu.CompilerParams(
            dimension_semantics=("parallel",)),              # megacore sharding on v7x
    )(enc, hid, w_enc_t, w_hid_t, bias2d, v2d)

    return out2d.reshape(B, 1, S)  # free reshape outside the kernel


def attn_reference(encoder_outputs, hidden, weight, bias, v):
    """Pure-JAX reference mirroring the PyTorch forward."""
    B, S, H = encoder_outputs.shape
    Hrep = jnp.broadcast_to(hidden[:, None, :], (B, S, H))
    cat = jnp.concatenate([Hrep, encoder_outputs], axis=2)        # (B, S, 2H)
    energy = jnp.tanh(cat @ weight.T + bias)                       # (B, S, H)
    scores = jnp.einsum("bsh,h->bs", energy, v)[:, None, :]        # (B, 1, S)
    return jax.nn.softmax(scores, axis=2)


if __name__ == "__main__":
    H = 32

    key = jax.random.PRNGKey(0)
    k_enc, k_hid, k_w, k_b, k_v = jax.random.split(key, 5)

    # Deterministic parameters (shapes match nn.Linear(2H, H); v ~ N(0, 1/sqrt(H)))
    stdv_lin = 1.0 / math.sqrt(2 * H)
    weight = jax.random.uniform(k_w, (H, 2 * H), jnp.float32, -stdv_lin, stdv_lin)
    bias = jax.random.uniform(k_b, (H,), jnp.float32, -stdv_lin, stdv_lin)
    v = jax.random.normal(k_v, (H,), dtype=jnp.float32) * (1.0 / math.sqrt(H))

    def run_case(B, S, tag, compute_dtype=jnp.float32, batch_tile=None, tol=2e-3):
        ke = jax.random.fold_in(k_enc, B * 1000 + S)
        kh = jax.random.fold_in(k_hid, B * 1000 + S)
        enc = jax.random.normal(ke, (B, S, H), dtype=jnp.float32)
        hid = jax.random.normal(kh, (B, H), dtype=jnp.float32)
        out = attn_forward(enc, hid, weight, bias, v,
                           compute_dtype=compute_dtype, batch_tile=batch_tile)
        out = jax.block_until_ready(out)
        ref = attn_reference(enc, hid, weight, bias, v)
        assert out.shape == (B, 1, S), (tag, out.shape)
        err = float(jnp.max(jnp.abs(out - ref)))
        assert err < tol, (tag, err)

    # Small case matching the module's nominal test shapes (single grid step, tb == B).
    run_case(B=2, S=8, tag="f32_small")
    # Tiled case: grid=(2,) over batch ("parallel" -> both TCs on v7x), pipelined enc DMA.
    run_case(B=16, S=8, tag="f32_tiled", batch_tile=8)
    # bf16 MXU/tanh compute path (the v6e/v7x option; keep f32 on v5e).
    run_case(B=16, S=8, tag="bf16_tiled", compute_dtype=jnp.bfloat16, batch_tile=8, tol=5e-2)

    print("KERNEL_OK")
</pallas_src>

<mosaic_0001>
module attributes {stable_mosaic.version = 11 : i64} {
  func.func @attn_kernel(%arg0: i32, %arg1: memref<2x8x32xf32, #tpu.memory_space<vmem>>, %arg2: memref<2x32xf32, #tpu.memory_space<vmem>>, %arg3: memref<32x32xf32, #tpu.memory_space<vmem>>, %arg4: memref<32x32xf32, #tpu.memory_space<vmem>>, %arg5: memref<1x32xf32, #tpu.memory_space<vmem>>, %arg6: memref<1x32xf32, #tpu.memory_space<vmem>>, %arg7: memref<2x8xf32, #tpu.memory_space<vmem>>) attributes {dimension_semantics = [#tpu.dimension_semantics<parallel>], iteration_bounds = array<i64: 1>, scalar_prefetch = 0 : i64, scratch_operands = 0 : i64, tpu.core_type = #tpu.core_type<tc>, window_params = [{transform_indices = @transform_0, window_bounds = array<i64: 2, 8, 32>}, {transform_indices = @transform_1, window_bounds = array<i64: 2, 32>}, {pipeline_mode = #tpu.pipeline_mode<synchronous>, transform_indices = @transform_2, window_bounds = array<i64: 32, 32>}, {pipeline_mode = #tpu.pipeline_mode<synchronous>, transform_indices = @transform_3, window_bounds = array<i64: 32, 32>}, {pipeline_mode = #tpu.pipeline_mode<synchronous>, transform_indices = @transform_4, window_bounds = array<i64: 1, 32>}, {pipeline_mode = #tpu.pipeline_mode<synchronous>, transform_indices = @transform_5, window_bounds = array<i64: 1, 32>}, {transform_indices = @transform_6, window_bounds = array<i64: 2, 8>}]} {
    %c0 = arith.constant 0 : index
    %c0_0 = arith.constant 0 : index
    %0 = vector.load %arg2[%c0, %c0_0] : memref<2x32xf32, #tpu.memory_space<vmem>>, vector<2x32xf32>
    %c0_1 = arith.constant 0 : index
    %c0_2 = arith.constant 0 : index
    %1 = vector.load %arg4[%c0_1, %c0_2] : memref<32x32xf32, #tpu.memory_space<vmem>>, vector<32x32xf32>
    %cst = arith.constant dense<0.000000e+00> : vector<2x32xf32>
    %2 = tpu.matmul %0, %1, %cst {dimension_numbers = #tpu.dot_dimension_numbers<[1], [0], [0], [1], [0, 0, 1, 1], [], []>} : vector<2x32xf32>, vector<32x32xf32>, vector<2x32xf32> -> vector<2x32xf32>
    %c0_3 = arith.constant 0 : index
    %c0_4 = arith.constant 0 : index
    %3 = vector.load %arg5[%c0_3, %c0_4] : memref<1x32xf32, #tpu.memory_space<vmem>>, vector<1x32xf32>
    %4 = vector.broadcast %3 : vector<1x32xf32> to vector<2x32xf32>
    %5 = arith.addf %2, %4 : vector<2x32xf32>
    %c0_5 = arith.constant 0 : index
    %c0_6 = arith.constant 0 : index
    %c0_7 = arith.constant 0 : index
    %6 = vector.load %arg1[%c0_5, %c0_6, %c0_7] : memref<2x8x32xf32, #tpu.memory_space<vmem>>, vector<2x8x32xf32>
    %7 = vector.shape_cast %6 : vector<2x8x32xf32> to vector<16x32xf32>
    %c0_8 = arith.constant 0 : index
    %c0_9 = arith.constant 0 : index
    %8 = vector.load %arg3[%c0_8, %c0_9] : memref<32x32xf32, #tpu.memory_space<vmem>>, vector<32x32xf32>
    %cst_10 = arith.constant dense<0.000000e+00> : vector<16x32xf32>
    %9 = tpu.matmul %7, %8, %cst_10 {dimension_numbers = #tpu.dot_dimension_numbers<[1], [0], [0], [1], [0, 0, 1, 1], [], []>} : vector<16x32xf32>, vector<32x32xf32>, vector<16x32xf32> -> vector<16x32xf32>
    %10 = vector.shape_cast %9 : vector<16x32xf32> to vector<2x8x32xf32>
    %11 = vector.shape_cast %5 : vector<2x32xf32> to vector<2x1x32xf32>
    %12 = vector.broadcast %11 : vector<2x1x32xf32> to vector<2x8x32xf32>
    %13 = arith.addf %10, %12 : vector<2x8x32xf32>
    %14 = math.tanh %13 : vector<2x8x32xf32>
    %c0_11 = arith.constant 0 : index
    %c0_12 = arith.constant 0 : index
    %15 = vector.load %arg6[%c0_11, %c0_12] : memref<1x32xf32, #tpu.memory_space<vmem>>, vector<1x32xf32>
    %16 = vector.shape_cast %15 : vector<1x32xf32> to vector<1x1x32xf32>
    %17 = vector.broadcast %16 : vector<1x1x32xf32> to vector<2x8x32xf32>
    %18 = arith.mulf %14, %17 : vector<2x8x32xf32>
    %cst_13 = arith.constant dense<0.000000e+00> : vector<2x8xf32>
    %19 = vector.multi_reduction <add>, %18, %cst_13 [2] : vector<2x8x32xf32> to vector<2x8xf32>
    %cst_14 = arith.constant dense<0xFF800000> : vector<2xf32>
    %20 = vector.multi_reduction <maximumf>, %19, %cst_14 [1] : vector<2x8xf32> to vector<2xf32>
    %21 = vector.shape_cast %20 : vector<2xf32> to vector<2x1xf32>
    %22 = vector.broadcast %21 : vector<2x1xf32> to vector<2x8xf32>
    %23 = arith.subf %19, %22 : vector<2x8xf32>
    %24 = math.exp %23 : vector<2x8xf32>
    %cst_15 = arith.constant dense<0.000000e+00> : vector<2xf32>
    %25 = vector.multi_reduction <add>, %24, %cst_15 [1] : vector<2x8xf32> to vector<2xf32>
    %26 = vector.shape_cast %25 : vector<2xf32> to vector<2x1xf32>
    %27 = tpu.reciprocal %26 {approx = true} : vector<2x1xf32> -> vector<2x1xf32>
    %28 = vector.broadcast %27 : vector<2x1xf32> to vector<2x8xf32>
    %29 = arith.mulf %24, %28 : vector<2x8xf32>
    %c0_16 = arith.constant 0 : index
    %c0_17 = arith.constant 0 : index
    %30 = vector.load %arg7[%c0_16, %c0_17] : memref<2x8xf32, #tpu.memory_space<vmem>>, vector<2x8xf32>
    tpu.vector_store %arg7[%c0_16, %c0_17], %29 {strides = array<i32>} : memref<2x8xf32, #tpu.memory_space<vmem>>, vector<2x8xf32>,
    return
  }
  func.func @transform_0(%arg0: i32) -> (i32, i32, i32) {
    %c0_i32 = arith.constant 0 : i32
    %c0_i32_0 = arith.constant 0 : i32
    %c0_i32_1 = arith.constant 0 : i32
    return %arg0, %c0_i32, %c0_i32_0 : i32, i32, i32
  }
  func.func @transform_1(%arg0: i32) -> (i32, i32) {
    %c0_i32 = arith.constant 0 : i32
    %c0_i32_0 = arith.constant 0 : i32
    return %arg0, %c0_i32 : i32, i32
  }
  func.func @transform_2(%arg0: i32) -> (i32, i32) {
    %c0_i32 = arith.constant 0 : i32
    %c0_i32_0 = arith.constant 0 : i32
    %c0_i32_1 = arith.constant 0 : i32
    return %c0_i32, %c0_i32_0 : i32, i32
  }
  func.func @transform_3(%arg0: i32) -> (i32, i32) {
    %c0_i32 = arith.constant 0 : i32
    %c0_i32_0 = arith.constant 0 : i32
    %c0_i32_1 = arith.constant 0 : i32
    return %c0_i32, %c0_i32_0 : i32, i32
  }
  func.func @transform_4(%arg0: i32) -> (i32, i32) {
    %c0_i32 = arith.constant 0 : i32
    %c0_i32_0 = arith.constant 0 : i32
    %c0_i32_1 = arith.constant 0 : i32
    return %c0_i32, %c0_i32_0 : i32, i32
  }
  func.func @transform_5(%arg0: i32) -> (i32, i32) {
    %c0_i32 = arith.constant 0 : i32
    %c0_i32_0 = arith.constant 0 : i32
    %c0_i32_1 = arith.constant 0 : i32
    return %c0_i32, %c0_i32_0 : i32, i32
  }
  func.func @transform_6(%arg0: i32) -> (i32, i32) {
    %c0_i32 = arith.constant 0 : i32
    %c0_i32_0 = arith.constant 0 : i32
    return %arg0, %c0_i32 : i32, i32
  }
}

</mosaic_0001>

<bundles_post_ra>
// kernel: tpu_custom_call.1
= control target key start
LH: loop header
LB: loop body
LE: loop exit
PB: predicated region body
PF: predicated region fallthrough
CT: control target
= control target key end

     0   :  { %11 = vsyncpa [#allocation3], 0  ;;  %s701_s0 = inlined_call_operand.hbm [shape: f32[2,8,32], index: 0, kind: input, shape index: {}]   ;;  %s702_s1 = inlined_call_operand.vmem [shape: f32[2,32], index: 1, kind: input, shape index: {}]   ;;  %s703_s2 = inlined_call_operand.hbm [shape: f32[32,32], index: 2, kind: input, shape index: {}]   ;;  %s704_s3 = inlined_call_operand.hbm [shape: f32[32,32], index: 3, kind: input, shape index: {}]   ;;  %s705_s4 = inlined_call_operand.vmem [shape: f32[1,32], index: 4, kind: input, shape index: {}]   ;;  %s706_s5 = inlined_call_operand.vmem [shape: f32[1,32], index: 5, kind: input, shape index: {}]   ;;  %s707_s6 = inlined_call_operand.hbm [shape: f32[2,8], index: 6, kind: output, shape index: {}]  }
   0x1   :  { %12 = vsyncpa [#allocation6], 0 }
   0x2   :  { %13 = vsyncpa [#allocation4], 0  ;;  %s565_s21 = smov [#allocation5]   ;;  %s566_s23 = smov [#allocation2]  }
   0x3   :  { %s33_s22 = sshll.u32 %s565_s21, 4  ;;  %s19_s24 = sshll.u32 %s566_s23, 4  ;;  %s34_s22 = int_to_ptr.vmem [resolvable:$true] %s33_s22  ;;  %s611_s24 = int_to_ptr.vmem [resolvable:$true] %s19_s24 }
   0x4   :  { %s471_s27 = scalar_lea.hbm %s703_s2, 512 }
   0x5   :  { %p472_p0 = scmp.ne.s32.totalorder %s703_s2, %s471_s27  ;;  %p475_p1 = scmp.lt.u32.totalorder %s471_s27, %s703_s2 }
   0x7   :  { %p477_p2 = pnand %p475_p1, %p472_p0 }
   0x9   :  { %480 = shalt.err (!%p477_p2)
}
   0xa   :  { %s481_s8 = scalar_lea.vmem %s34_s22, 512  ;;  %p486_p4 = scmp.lt.s32.totalorder %s34_s22, %s34_s22 }
   0xb   :  { %p482_p3 = scmp.ne.s32.totalorder %s34_s22, %s481_s8  ;;  %p487_p5 = scmp.lt.s32.totalorder %s481_s8, %s481_s8 }
   0xd   :  { %p488_p6 = por %p487_p5, %p486_p4 }
   0xf   :  { %p489_p7 = pnand %p488_p6, %p482_p3 }
  0x11   :  { %492 = shalt.err (!%p489_p7)
}
  0x12   :  { %s567_s9 = smov 128   ;;  %s568_s10 = smov 8  }
  0x13   :  { %39 = dma.hbm_to_vmem [thread:$0]  %s703_s2, 512, %s34_s22, [#allocation6], %s567_s9, %s567_s9, %s568_s10  }
  0x14   :  { %s493_s15 = scalar_lea.hbm %s701_s0, 256 }
  0x15   :  { %p494_p8 = scmp.ne.s32.totalorder %s701_s0, %s493_s15  ;;  %p497_p9 = scmp.lt.u32.totalorder %s493_s15, %s701_s0 }
  0x17   :  { %p499_p10 = pnand %p497_p9, %p494_p8 }
  0x19   :  { %502 = shalt.err (!%p499_p10)
}
  0x1a   :  { %s503_s20 = scalar_lea.vmem %s611_s24, 256  ;;  %p508_p12 = scmp.lt.s32.totalorder %s611_s24, %s611_s24 }
  0x1b   :  { %p504_p11 = scmp.ne.s32.totalorder %s611_s24, %s503_s20  ;;  %p509_p13 = scmp.lt.s32.totalorder %s503_s20, %s503_s20 }
  0x1d   :  { %p510_p0 = por %p509_p13, %p508_p12 }
  0x1f   :  { %p511_p1 = pnand %p510_p0, %p504_p11 }
  0x21   :  { %514 = shalt.err (!%p511_p1)
}
  0x22   :  { %25 = dma.hbm_to_vmem [thread:$0]  %s701_s0, 256, %s611_s24, [#allocation3], %s567_s9, %s567_s9, %s568_s10  }
  0x23   :  { %s569_s22 = smov [#allocation7]   ;;  %s515_s27 = scalar_lea.hbm %s704_s3, 512 }
  0x24   :  { %s45_s23 = sshll.u32 %s569_s22, 4  ;;  %p516_p2 = scmp.ne.s32.totalorder %s704_s3, %s515_s27  ;;  %s46_s23 = int_to_ptr.vmem [resolvable:$true] %s45_s23 }
  0x25   :  { %p519_p3 = scmp.lt.u32.totalorder %s515_s27, %s704_s3 }
  0x27   :  { %p521_p4 = pnand %p519_p3, %p516_p2 }
  0x29   :  { %524 = shalt.err (!%p521_p4)
}
  0x2a   :  { %s525_s8 = scalar_lea.vmem %s46_s23, 512  ;;  %p530_p6 = scmp.lt.s32.totalorder %s46_s23, %s46_s23 }
  0x2b   :  { %p526_p5 = scmp.ne.s32.totalorder %s46_s23, %s525_s8  ;;  %p531_p7 = scmp.lt.s32.totalorder %s525_s8, %s525_s8 }
  0x2d   :  { %p532_p8 = por %p531_p7, %p530_p6 }
  0x2f   :  { %p533_p9 = pnand %p532_p8, %p526_p5 }
  0x31   :  { %536 = shalt.err (!%p533_p9)
}
  0x32   :  { %51 = dma.hbm_to_vmem [thread:$0]  %s704_s3, 512, %s46_s23, [#allocation6], %s567_s9, %s567_s9, %s568_s10  }
  0x33   :  { %559 = dma.done.wait [#allocation3], 256  }
  0x34   :  { %560 = vsyncadd [#allocation3], 4294967040 }
  0x35   :  { %561 = dma.done.wait [#allocation6], 1024  }
  0x36   :  { %562 = vsyncadd [#allocation6], 4294966272  ;;  %v570_v0 = vmov 0.0|0.0   ;;  %vm571_vm0 = vmmov 0   ;;  %v572_v1 = vmov 0.0   ;;  %v66_v2 = vld [vmem:[#allocation7] sm:$0xff]  ;;  %v242_v19 = vlaneseq }
  0x37   :  { %434 = vmatprep.subr.bf16.mxu0 %v570_v0  ;;  %420 = vmatprep.mubr.msk.f32.mxu0 %vm571_vm0, %v572_v1  ;;  %v67_v3 = vld [vmem:[#allocation7 + $0x8] sm:$0xff]  ;;  %v68_v4 = vld [vmem:[#allocation7 + $0x10] sm:$0xff]  ;;  %v69_v6 = vld [vmem:[#allocation7 + $0x18] sm:$0xff]  ;;  %vm77_vm1 = vcmask 261120   ;;  %v573_v17 = vmov 1966171168  }
  0x38   :  { %v435_v5 = vpack.c.bf16 %v67_v3, %v66_v2  ;;  %v153_v7 = vld [vmem:[#allocation5] sm:$0xff]  ;;  %v154_v8 = vld [vmem:[#allocation5 + $0x8] sm:$0xff]  ;;  %v155_v10 = vld [vmem:[#allocation5 + $0x10] sm:$0xff]  ;;  %v438_v12 = vpack.c.bf16 %v69_v6, %v68_v4  ;;  %v240_v18 = vunpack.c.l.s4 %v573_v17  ;;  %v669_v21 = vshrl.u32 %v242_v19, 7 }
  0x39   :  { %v440_v9 = vpack.c.bf16 %v154_v8, %v153_v7  ;;  %v156_v11 = vld [vmem:[#allocation5 + $0x18] sm:$0xff]  ;;  %v151_v14 = vld [vmem:[#allocation2] sm:$0xff]  ;;  %v293_v45 = vand.u32 127, %v242_v19  ;;  %vm302_vm2 = vcmask 1041409   ;;  %vm305_vm3 = vcmask 58368  }
  0x3a   :  { %436 = vmatpush3.bf16.msra.mxu0 %v435_v5  ;;  %v444_v13 = vpack.c.bf16 %v156_v11, %v155_v10  ;;  %431 = vmatprep.mubr.msk.f32.mxu1 %vm77_vm1, %v151_v14  ;;  %v65_v15 = vld [vmem:[%s702_s1] sm:$0x3]  ;;  %v152_v16 = vld [vmem:[#allocation2 + $0x8] sm:$0xff]  ;;  %v241_v20 = vunpack.c.0.s8 %v240_v18  ;;  %v263_v29 = vsub.s32 0, %v669_v21  ;;  %v574_v53 = vmov 0  }
  0x3b   :  { %437 = vmatprep.subr.bf16.mxu0 %v570_v0  ;;  %441 = vmatprep.subr.bf16.mxu1 %v440_v9  ;;  %v396_v22 = vld [vmem:[%s705_s4] ss:$0 sm:$0xff]  ;;  %v296_v47 = vsub.s32 %v293_v45, %v669_v21  ;;  %v316_v54 = vsub.s32 1, %v669_v21 }
  0x3c   :  { %443 = vmatpush3.bf16.msra.mxu1 %v440_v9  ;;  %v244_v23 = vsub.s32 %v241_v20, %v669_v21  ;;  %v400_v38 = vld [vmem:[%s706_s5] ss:$0 sm:$0xff]  ;;  %460 = vset.pattern.permute.xlu0 %v574_v53  ;;  %s575_s5 = smov [#allocation8]  }
  0x3d   :  { %445 = vmatprep.subr.bf16.mxu1 %v444_v13  ;;  %459 = vset.pattern.permute.xlu1 %v574_v53  ;;  %s386_s12 = sshll.u32 %s575_s5, 4  ;;  %s387_s12 = int_to_ptr.vmem [resolvable:$true] %s386_s12 }
  0x3e   :  { %439 = vmatpush3.bf16.msra.mxu0 %v438_v12  ;;  %s537_s13 = scalar_lea.vmem %s387_s12, 32  ;;  %p542_p11 = scmp.lt.s32.totalorder %s387_s12, %s387_s12 }
  0x3f   :  { %p538_p10 = scmp.ne.s32.totalorder %s387_s12, %s537_s13  ;;  %p543_p12 = scmp.lt.s32.totalorder %s537_s13, %s537_s13 }
  0x40   :  { %447 = vmatpush3.bf16.msra.mxu1 %v444_v13 }
  0x41   :  { %421 = vmatmul.mubr.msk.f32.vlgmr.msra.gmra.mrb[0].mxu0 %vm77_vm1, %v65_v15  ;;  %p544_p13 = por %p543_p12, %p542_p11 }
  0x43   :  { %432 = vmatmul.mubr.msk.f32.vlgmr.msra.gmra.mrb[0].mxu1 %vm77_vm1, %v152_v16  ;;  %p545_p0 = pnand %p544_p13, %p538_p10 }
 0x114   :  { %v147_v24 = vpop.f32.mrb[0].mxu0 }
 0x115   :  { %v148_v25 = vadd.f32 %v396_v22, %v147_v24  ;;  %v422_v26 = vpop.f32.mrb[1].mxu0 }
 0x116   :  { %v433_v27 = vpop.f32.mrb[0].mxu1 }
 0x117   :  { %v245_v28 = vrot.slane %v148_v25, %v244_v23  ;;  %v229_v30 = vpop.f32.mrb[1].mxu1 }
 0x119   :  { %v246_v31 = vcombine.high %v245_v28, %v245_v28  ;;  %v253_v32 = vrot.slane %v245_v28, %v244_v23 }
 0x11b   :  { %v260_v33 = vrot.slane %v246_v31, %v244_v23  ;;  %v264_v34 = vrot.slane %v253_v32, %v263_v29 }
 0x11d   :  { %v268_v35 = vrot.slane %v260_v33, %v263_v29  ;;  %v271_v36 = vadd.f32 %v264_v34, %v229_v30 }
 0x11f   :  { %v272_v37 = vadd.f32 %v433_v27, %v268_v35  ;;  %461 = vtanh.f32 %v271_v36 }
 0x121   :  { %463 = vtanh.f32 %v272_v37 }
 0x129   :  { %v462_v39 = vpop.eup %461 }
 0x12a   :  { %v282_v40 = vmul.f32 %v462_v39, %v400_v38 }
 0x12b   :  { %v464_v41 = vpop.eup %463 }
 0x12c   :  { %v284_v42 = vsel %vm77_vm1, %v282_v40, 0.0  ;;  %v283_v43 = vmul.f32 %v464_v41, %v400_v38 }
 0x12d   :  { %285 = vadd.xlane.f32.xlu0 %v284_v42 }
 0x12e   :  { %v287_v44 = vsel %vm77_vm1, %v283_v43, 0.0 }
 0x131   :  { %288 = vadd.xlane.f32.xlu0 %v287_v44 }
 0x1ba   :  { %v286_v46 = vpop.xlane.xlu0 %285 }
 0x1bb   :  { %v297_v49 = vrot.slane %v286_v46, %v296_v47 }
 0x1be   :  { %v289_v48 = vpop.xlane.xlu0 %288 }
 0x1bf   :  { %v301_v50 = vrot.slane %v289_v48, %v296_v47 }
 0x1c1   :  { %v303_v51 = vsel %vm302_vm2, %v301_v50, %v297_v49 }
 0x1c2   :  { %v306_v52 = vsel %vm305_vm3, %v303_v51, -inf }
 0x1c3   :  { %307 = vmax.xlane.f32.xlu1 %v306_v52 }
 0x250   :  { %v308_v55 = vpop.xlane.xlu1 %307 }
 0x251   :  { %v313_v56 = vrot.slane %v308_v55, %v263_v29  ;;  %v317_v57 = vrot.slane %v308_v55, %v316_v54 }
 0x253   :  { %v320_v58 = vsub.f32 %v286_v46, %v313_v56  ;;  %v321_v59 = vsub.f32 %v289_v48, %v317_v57 }
 0x255   :  { %v322_v60 = vmul.f32 1.442695, %v320_v58  ;;  %v324_v61 = vmul.f32 1.442695, %v321_v59 }
 0x257   :  { %465 = vpow2.f32 %v322_v60 }
 0x258   :  { %467 = vpow2.f32 %v324_v61 }
 0x261   :  { %v466_v62 = vpop.eup %465 }
 0x262   :  { %v468_v63 = vpop.eup %467  ;;  %329 = vperm.xlu1 %459, %v466_v62  }
 0x263   :  { %332 = vperm.xlu0 %460, %v468_v63  }
 0x2e1   :  { %v330_v0 = vpop.permute.xlu1 %329 }
 0x2e2   :  { %v333_v1 = vpop.permute.xlu0 %332  ;;  %v337_v2 = vrot.slane %v330_v0, %v296_v47 }
 0x2e3   :  { %v341_v3 = vrot.slane %v333_v1, %v296_v47 }
 0x2e5   :  { %v342_v4 = vsel %vm302_vm2, %v341_v3, %v337_v2 }
 0x2e6   :  { %v344_v5 = vsel %vm305_vm3, %v342_v4, 0.0 }
 0x2e7   :  { %345 = vadd.xlane.f32.xlu1 %v344_v5 }
 0x374   :  { %v346_v6 = vpop.xlane.xlu1 %345 }
 0x375   :  { %469 = vrcp.f32 %v346_v6 }
 0x37f   :  { %v470_v7 = vpop.eup %469 }
 0x380   :  { %v352_v8 = vrot.slane %v470_v7, %v263_v29  ;;  %v356_v10 = vrot.slane %v470_v7, %v316_v54 }
 0x382   :  { %v359_v9 = vmul.f32 %v466_v62, %v352_v8  ;;  %v360_v11 = vmul.f32 %v468_v63, %v356_v10 }
 0x384   :  { %364 = vperm.xlu0 %460, %v359_v9  }
 0x388   :  { %367 = vperm.xlu0 %460, %v360_v11  }
 0x403   :  { %v365_v12 = vpop.permute.xlu0 %364 }
 0x404   :  { %v372_v14 = vrot.slane %v365_v12, %v296_v47 }
 0x407   :  { %v368_v13 = vpop.permute.xlu0 %367 }
 0x408   :  { %v376_v15 = vrot.slane %v368_v13, %v296_v47 }
 0x40a   :  { %v377_v16 = vsel %vm302_vm2, %v376_v15, %v372_v14 }
 0x40b   :  { %379 = vst.msk [vmem:[#allocation8] sm:$0x3] %vm305_vm3, %v377_v16 }
 0x40c   :  { %548 = shalt.err (!%p545_p0)
}
 0x40d   :  { %s549_s16 = scalar_lea.hbm %s707_s6, 32 }
 0x40e   :  { %p550_p1 = scmp.ne.s32.totalorder %s707_s6, %s549_s16  ;;  %p553_p2 = scmp.lt.u32.totalorder %s549_s16, %s707_s6 }
 0x410   :  { %p555_p3 = pnand %p553_p2, %p550_p1 }
 0x412   :  { %558 = shalt.err (!%p555_p3)
}
 0x413   :  { %389 = dma.vmem_to_hbm [thread:$0]  %s387_s12, 32, %s707_s6, [#allocation4]  }
 0x414   :  { %563 = dma.done.wait [#allocation4], 32  }
 0x415   :  { %564 = vsyncadd [#allocation4], 4294967264 }
 0x416   :  { %393 = vsyncpa [#allocation3], 1 }
 0x417   :  { %394 = vsyncpa [#allocation6], 1 }
 0x418   :  { %395 = vsyncpa [#allocation4], 1 }

</bundles_post_ra>
